<compile_context>
chip_gen: v7x
topology: tpu7x:2x2x1
jax: 0.10.0
libtpu: 0.0.40
codegen_flags: <defaults>
</compile_context>

<pallas_src>
import functools

import jax
import jax.numpy as jnp
from jax.experimental import pallas as pl
from jax.experimental.pallas import tpu as pltpu

HALF_LVLS = 127.0  # (2**8 - 2) / 2


def _fold_bn(gamma, beta, running_mean, running_var, eps=1e-5):
    scale = gamma / jnp.sqrt(running_var + eps)
    bias = beta - running_mean * scale
    return scale, bias


def prepare_basic_block(params, W, eps=1e-5):
    """One-time parameter preprocessing (hoisted out of the per-call forward).

    - quantize weights to integer levels (exact in bf16)
    - build no-halo (3, W*Cin, W*Cout) block-Toeplitz matrices (scatter-free)
    - fold the 1/127 step size and the BN scale into per-lane f32 epilogue
      vectors; tile the BN bias to per-lane layout (lane index = w*C + c)
    """
    w1, w2 = params["w1"], params["w2"]
    kh, kw, C, planes = w1.shape
    assert planes == C, "stride=1 / downsample=None requires inplanes == planes"

    def levels(w):  # quan_Conv2d: clamp(round(w*127), -127, 127) (integer levels)
        return jnp.clip(jnp.round(w * HALF_LVLS), -HALF_LVLS, HALF_LVLS)

    s1, b1 = _fold_bn(*params["bn1"], eps=eps)
    s2, b2 = _fold_bn(*params["bn2"], eps=eps)

    # shift[kx, u, w] = 1 iff packed source column block u == w + kx - 1
    # ("SAME" padding in the lane/column direction is encoded as zero blocks).
    shift = jnp.stack([jnp.eye(W, W, 1 - kx, dtype=jnp.float32) for kx in range(kw)])

    def toeplitz(lv):
        # lv: (3, 3, Cin, Cout) integer-valued f32
        # T[ky, u*Cin+ci, w*Cout+co] = lv[ky, kx, ci, co]  where u = w + kx - 1
        t = jnp.einsum("xuw,kxio->kuiwo", shift, lv)
        return t.reshape(kh, W * C, W * planes).astype(jnp.bfloat16)  # exact ints

    def lanes(v):  # per-channel (Cout,) -> per-lane (1, W*Cout) f32
        return jnp.tile(v, W).reshape(1, W * planes).astype(jnp.float32)

    return {
        "t1": toeplitz(levels(w1)), "t2": toeplitz(levels(w2)),
        "s1": lanes(s1 / HALF_LVLS), "b1": lanes(b1),
        "s2": lanes(s2 / HALF_LVLS), "b2": lanes(b2),
    }


def _basic_block_kernel(x_ref, t1_ref, s1_ref, b1_ref, t2_ref, s2_ref, b2_ref,
                        out_ref, xp_scr, y1_scr, *, Nb, H, WC):
    # x_ref  : (Nb, H, WC)  f32, channel-packed NHWC (lane = w*C + c), unpadded
    # t*_ref : (3, WC, WC)  bf16 block-Toeplitz conv weights (integer levels)
    # s*_ref : (1, WC)      f32 per-lane scale = BN_scale / 127
    # b*_ref : (1, WC)      f32 per-lane folded BN bias
    # out_ref: (Nb, H, WC)  f32, lane-dense output
    # xp_scr : (Nb*(H+2), WC) bf16 row-padded MXU operand (input)
    # y1_scr : (Nb*(H+2), WC) bf16 row-padded MXU operand (stage-1 activation)
    HP = H + 2
    M = Nb * HP - 2                      # stacked matmul M (junk rows never stored)
    zero_row = jnp.zeros((1, WC), jnp.bfloat16)

    # Stage the row-padded bf16 conv operand; only the 2*Nb pad rows get zeros.
    for n in range(Nb):
        b = n * HP
        xp_scr[b:b + 1, :] = zero_row
        xp_scr[b + 1:b + H + 1, :] = x_ref[n].astype(jnp.bfloat16)
        xp_scr[b + H + 1:b + H + 2, :] = zero_row

    # ---- stage 1: quantized conv1 + BN1 + ReLU ----
    acc1 = jnp.zeros((M, WC), jnp.float32)
    for ky in range(3):
        acc1 = acc1 + jnp.dot(xp_scr[ky:ky + M, :], t1_ref[ky],
                              preferred_element_type=jnp.float32)
    y1 = jnp.maximum(acc1 * s1_ref[...] + b1_ref[...], 0.0).astype(jnp.bfloat16)

    # Re-pad stage-1 activation in VMEM (never touches HBM).
    for n in range(Nb):
        b = n * HP
        y1_scr[b:b + 1, :] = zero_row
        y1_scr[b + 1:b + H + 1, :] = y1[b:b + H, :]
        y1_scr[b + H + 1:b + H + 2, :] = zero_row

    # ---- stage 2: quantized conv2 + BN2 + residual add + ReLU ----
    acc2 = jnp.zeros((M, WC), jnp.float32)
    for ky in range(3):
        acc2 = acc2 + jnp.dot(y1_scr[ky:ky + M, :], t2_ref[ky],
                              preferred_element_type=jnp.float32)
    y2 = acc2 * s2_ref[...] + b2_ref[...]
    for n in range(Nb):
        b = n * HP
        out_ref[n, :, :] = jnp.maximum(y2[b:b + H, :] + x_ref[n], 0.0)


def _pick_batch_block(N):
    # Fatten MXU M by stacking images; prefer >=2 grid steps (v7x megacore).
    for nb in (8, 4, 2):
        if N % nb == 0 and N // nb >= 2:
            return nb
    for nb in (8, 4, 2):
        if N % nb == 0:
            return nb
    return 1


def basic_block_forward(x_nchw, prep):
    """BasicBlock forward (stride=1, downsample=None). x_nchw: (N, C, H, W) f32."""
    N, C, H, W = x_nchw.shape
    WC = W * C
    Nb = _pick_batch_block(N)
    G = N // Nb

    # TODO(synk): keep the surrounding model NHWC end-to-end to drop this transpose.
    x = jnp.transpose(x_nchw, (0, 2, 3, 1)).reshape(N, H, WC)

    kernel = functools.partial(_basic_block_kernel, Nb=Nb, H=H, WC=WC)

    const2d = pl.BlockSpec((1, WC), lambda g: (0, 0))
    out = pl.pallas_call(
        kernel,
        out_shape=jax.ShapeDtypeStruct((N, H, WC), jnp.float32),
        grid=(G,),
        in_specs=[
            pl.BlockSpec((Nb, H, WC), lambda g: (g, 0, 0)),
            # NOTE: grid-constant operands; at real widths single-buffer them
            # with pipeline_mode=pl.Buffered(1) to halve their VMEM footprint.
            pl.BlockSpec((3, WC, WC), lambda g: (0, 0, 0)),
            const2d, const2d,
            pl.BlockSpec((3, WC, WC), lambda g: (0, 0, 0)),
            const2d, const2d,
        ],
        out_specs=pl.BlockSpec((Nb, H, WC), lambda g: (g, 0, 0)),
        scratch_shapes=[
            pltpu.VMEM((Nb * (H + 2), WC), jnp.bfloat16),  # padded bf16 input
            pltpu.VMEM((Nb * (H + 2), WC), jnp.bfloat16),  # padded bf16 stage-1 act
        ],
        compiler_params=pltpu.CompilerParams(
            dimension_semantics=("parallel",)),
    )(x, prep["t1"], prep["s1"], prep["b1"], prep["t2"], prep["s2"], prep["b2"])

    out = out.reshape(N, H, W, C)
    return jnp.transpose(out, (0, 3, 1, 2))  # back to NCHW


# ---------------------------- references -----------------------------------
def reference_forward(x_nchw, params):
    """Pure-JAX f32 reference with the original module's math."""
    x = jnp.transpose(x_nchw, (0, 2, 3, 1))

    def qconv(xi, w):
        wq = jnp.clip(jnp.round(w * HALF_LVLS), -HALF_LVLS, HALF_LVLS) / HALF_LVLS
        return jax.lax.conv_general_dilated(
            xi, wq, window_strides=(1, 1), padding="SAME",
            dimension_numbers=("NHWC", "HWIO", "NHWC"))

    s1, b1 = _fold_bn(*params["bn1"])
    s2, b2 = _fold_bn(*params["bn2"])
    y = jnp.maximum(qconv(x, params["w1"]) * s1 + b1, 0.0)
    y = jnp.maximum(qconv(y, params["w2"]) * s2 + b2 + x, 0.0)
    return jnp.transpose(y, (0, 3, 1, 2))


def reference_forward_bf16(x_nchw, params):
    """Reference matching the kernel's mixed precision exactly
    (bf16 conv operands with exact integer weight levels, f32 accumulate,
    f32 epilogue scale/bias/residual)."""
    x = jnp.transpose(x_nchw, (0, 2, 3, 1))

    def qconv_lv(xi, w):
        lv = jnp.clip(jnp.round(w * HALF_LVLS), -HALF_LVLS, HALF_LVLS)
        return jax.lax.conv_general_dilated(
            xi.astype(jnp.bfloat16), lv.astype(jnp.bfloat16),
            window_strides=(1, 1), padding="SAME",
            dimension_numbers=("NHWC", "HWIO", "NHWC"),
            preferred_element_type=jnp.float32)

    s1, b1 = _fold_bn(*params["bn1"])
    s2, b2 = _fold_bn(*params["bn2"])
    y = jnp.maximum(qconv_lv(x, params["w1"]) * (s1 / HALF_LVLS) + b1, 0.0)
    y = jnp.maximum(qconv_lv(y, params["w2"]) * (s2 / HALF_LVLS) + b2 + x, 0.0)
    return jnp.transpose(y, (0, 3, 1, 2))


if __name__ == "__main__":
    key = jax.random.PRNGKey(0)
    N, C, H, W = 2, 8, 16, 16   # inplanes = planes = 8, stride = 1 (W*C = 128 lanes)
    planes = C

    (k_x, k_w1, k_w2, k_g1, k_b1, k_g2, k_b2,
     k_m1, k_v1, k_m2, k_v2) = jax.random.split(key, 11)
    x = jax.random.normal(k_x, (N, C, H, W), jnp.float32)

    params = {
        "w1": jax.random.normal(k_w1, (3, 3, C, planes), jnp.float32) * 0.1,
        "w2": jax.random.normal(k_w2, (3, 3, planes, planes), jnp.float32) * 0.1,
        "bn1": (jax.random.uniform(k_g1, (planes,), jnp.float32, 0.5, 1.5),
                jax.random.normal(k_b1, (planes,), jnp.float32) * 0.1,
                jax.random.normal(k_m1, (planes,), jnp.float32) * 0.1,
                jax.random.uniform(k_v1, (planes,), jnp.float32, 0.5, 1.5)),
        "bn2": (jax.random.uniform(k_g2, (planes,), jnp.float32, 0.5, 1.5),
                jax.random.normal(k_b2, (planes,), jnp.float32) * 0.1,
                jax.random.normal(k_m2, (planes,), jnp.float32) * 0.1,
                jax.random.uniform(k_v2, (planes,), jnp.float32, 0.5, 1.5)),
    }

    # One-time parameter preprocessing (cached; not re-traced per forward).
    prep = jax.tree_util.tree_map(jnp.asarray, prepare_basic_block(params, W))

    fwd = jax.jit(basic_block_forward)
    out = jax.block_until_ready(fwd(x, prep))

    ref_bf16 = jax.block_until_ready(jax.jit(reference_forward_bf16)(x, params))
    ref_f32 = jax.block_until_ready(jax.jit(reference_forward)(x, params))

    assert out.shape == (N, planes, H, W)
    # Tight check: kernel == intended mixed-precision math (bf16 operands, f32 accum).
    assert jnp.allclose(out, ref_bf16, atol=1e-2, rtol=1e-2), "mismatch vs bf16-matched reference"
    # Semantics check vs the full-f32 PyTorch-style forward (bf16 operand rounding only).
    assert jnp.allclose(out, ref_f32, atol=5e-2, rtol=5e-2), "mismatch vs f32 reference"

    print("KERNEL_OK")
</pallas_src>

<mosaic_0001>
module attributes {stable_mosaic.version = 11 : i64} {
  func.func @_basic_block_kernel(%arg0: i32, %arg1: memref<2x16x128xf32, #tpu.memory_space<vmem>>, %arg2: memref<3x128x128xbf16, #tpu.memory_space<vmem>>, %arg3: memref<1x128xf32, #tpu.memory_space<vmem>>, %arg4: memref<1x128xf32, #tpu.memory_space<vmem>>, %arg5: memref<3x128x128xbf16, #tpu.memory_space<vmem>>, %arg6: memref<1x128xf32, #tpu.memory_space<vmem>>, %arg7: memref<1x128xf32, #tpu.memory_space<vmem>>, %arg8: memref<2x16x128xf32, #tpu.memory_space<vmem>>, %arg9: memref<36x128xbf16, #tpu.memory_space<vmem>>, %arg10: memref<36x128xbf16, #tpu.memory_space<vmem>>) attributes {dimension_semantics = [#tpu.dimension_semantics<parallel>], iteration_bounds = array<i64: 1>, scalar_prefetch = 0 : i64, scratch_operands = 2 : i64, tpu.core_type = #tpu.core_type<tc>, window_params = [{transform_indices = @transform_0, window_bounds = array<i64: 2, 16, 128>}, {pipeline_mode = #tpu.pipeline_mode<synchronous>, transform_indices = @transform_1, window_bounds = array<i64: 3, 128, 128>}, {pipeline_mode = #tpu.pipeline_mode<synchronous>, transform_indices = @transform_2, window_bounds = array<i64: 1, 128>}, {pipeline_mode = #tpu.pipeline_mode<synchronous>, transform_indices = @transform_3, window_bounds = array<i64: 1, 128>}, {pipeline_mode = #tpu.pipeline_mode<synchronous>, transform_indices = @transform_4, window_bounds = array<i64: 3, 128, 128>}, {pipeline_mode = #tpu.pipeline_mode<synchronous>, transform_indices = @transform_5, window_bounds = array<i64: 1, 128>}, {pipeline_mode = #tpu.pipeline_mode<synchronous>, transform_indices = @transform_6, window_bounds = array<i64: 1, 128>}, {transform_indices = @transform_7, window_bounds = array<i64: 2, 16, 128>}]} {
    %cst = arith.constant 0.000000e+00 : bf16
    %0 = vector.broadcast %cst : bf16 to vector<1x128xbf16>
    %c0 = arith.constant 0 : index
    %c0_0 = arith.constant 0 : index
    %1 = vector.load %arg9[%c0, %c0_0] : memref<36x128xbf16, #tpu.memory_space<vmem>>, vector<1x128xbf16>
    tpu.vector_store %arg9[%c0, %c0_0], %0 {strides = array<i32>} : memref<36x128xbf16, #tpu.memory_space<vmem>>, vector<1x128xbf16>,
    %c0_1 = arith.constant 0 : index
    %c0_2 = arith.constant 0 : index
    %c0_3 = arith.constant 0 : index
    %2 = vector.load %arg1[%c0_1, %c0_2, %c0_3] : memref<2x16x128xf32, #tpu.memory_space<vmem>>, vector<1x16x128xf32>
    %3 = vector.shape_cast %2 : vector<1x16x128xf32> to vector<16x128xf32>
    %4 = arith.truncf %3 : vector<16x128xf32> to vector<16x128xbf16>
    %c1 = arith.constant 1 : index
    %c0_4 = arith.constant 0 : index
    %5 = vector.load %arg9[%c1, %c0_4] : memref<36x128xbf16, #tpu.memory_space<vmem>>, vector<16x128xbf16>
    tpu.vector_store %arg9[%c1, %c0_4], %4 {strides = array<i32>} : memref<36x128xbf16, #tpu.memory_space<vmem>>, vector<16x128xbf16>,
    %c17 = arith.constant 17 : index
    %c0_5 = arith.constant 0 : index
    %6 = vector.load %arg9[%c17, %c0_5] : memref<36x128xbf16, #tpu.memory_space<vmem>>, vector<1x128xbf16>
    tpu.vector_store %arg9[%c17, %c0_5], %0 {strides = array<i32>} : memref<36x128xbf16, #tpu.memory_space<vmem>>, vector<1x128xbf16>,
    %c18 = arith.constant 18 : index
    %c0_6 = arith.constant 0 : index
    %7 = vector.load %arg9[%c18, %c0_6] : memref<36x128xbf16, #tpu.memory_space<vmem>>, vector<1x128xbf16>
    tpu.vector_store %arg9[%c18, %c0_6], %0 {strides = array<i32>} : memref<36x128xbf16, #tpu.memory_space<vmem>>, vector<1x128xbf16>,
    %c1_7 = arith.constant 1 : index
    %c0_8 = arith.constant 0 : index
    %c0_9 = arith.constant 0 : index
    %8 = vector.load %arg1[%c1_7, %c0_8, %c0_9] : memref<2x16x128xf32, #tpu.memory_space<vmem>>, vector<1x16x128xf32>
    %9 = vector.shape_cast %8 : vector<1x16x128xf32> to vector<16x128xf32>
    %10 = arith.truncf %9 : vector<16x128xf32> to vector<16x128xbf16>
    %c19 = arith.constant 19 : index
    %c0_10 = arith.constant 0 : index
    %11 = vector.load %arg9[%c19, %c0_10] : memref<36x128xbf16, #tpu.memory_space<vmem>>, vector<16x128xbf16>
    tpu.vector_store %arg9[%c19, %c0_10], %10 {strides = array<i32>} : memref<36x128xbf16, #tpu.memory_space<vmem>>, vector<16x128xbf16>,
    %c35 = arith.constant 35 : index
    %c0_11 = arith.constant 0 : index
    %12 = vector.load %arg9[%c35, %c0_11] : memref<36x128xbf16, #tpu.memory_space<vmem>>, vector<1x128xbf16>
    tpu.vector_store %arg9[%c35, %c0_11], %0 {strides = array<i32>} : memref<36x128xbf16, #tpu.memory_space<vmem>>, vector<1x128xbf16>,
    %cst_12 = arith.constant 0.000000e+00 : f32
    %13 = vector.broadcast %cst_12 : f32 to vector<34x128xf32>
    %c0_13 = arith.constant 0 : index
    %c0_14 = arith.constant 0 : index
    %14 = vector.load %arg9[%c0_13, %c0_14] : memref<36x128xbf16, #tpu.memory_space<vmem>>, vector<34x128xbf16>
    %c0_15 = arith.constant 0 : index
    %c0_16 = arith.constant 0 : index
    %c0_17 = arith.constant 0 : index
    %15 = vector.load %arg2[%c0_15, %c0_16, %c0_17] : memref<3x128x128xbf16, #tpu.memory_space<vmem>>, vector<1x128x128xbf16>
    %16 = vector.shape_cast %15 : vector<1x128x128xbf16> to vector<128x128xbf16>
    %cst_18 = arith.constant dense<0.000000e+00> : vector<34x128xf32>
    %17 = tpu.matmul %14, %16, %cst_18 {dimension_numbers = #tpu.dot_dimension_numbers<[1], [0], [0], [1], [0, 0, 1, 1], [], []>} : vector<34x128xbf16>, vector<128x128xbf16>, vector<34x128xf32> -> vector<34x128xf32>
    %18 = arith.addf %13, %17 : vector<34x128xf32>
    %c1_19 = arith.constant 1 : index
    %c0_20 = arith.constant 0 : index
    %19 = vector.load %arg9[%c1_19, %c0_20] : memref<36x128xbf16, #tpu.memory_space<vmem>>, vector<34x128xbf16>
    %c1_21 = arith.constant 1 : index
    %c0_22 = arith.constant 0 : index
    %c0_23 = arith.constant 0 : index
    %20 = vector.load %arg2[%c1_21, %c0_22, %c0_23] : memref<3x128x128xbf16, #tpu.memory_space<vmem>>, vector<1x128x128xbf16>
    %21 = vector.shape_cast %20 : vector<1x128x128xbf16> to vector<128x128xbf16>
    %cst_24 = arith.constant dense<0.000000e+00> : vector<34x128xf32>
    %22 = tpu.matmul %19, %21, %cst_24 {dimension_numbers = #tpu.dot_dimension_numbers<[1], [0], [0], [1], [0, 0, 1, 1], [], []>} : vector<34x128xbf16>, vector<128x128xbf16>, vector<34x128xf32> -> vector<34x128xf32>
    %23 = arith.addf %18, %22 : vector<34x128xf32>
    %c2 = arith.constant 2 : index
    %c0_25 = arith.constant 0 : index
    %24 = vector.load %arg9[%c2, %c0_25] : memref<36x128xbf16, #tpu.memory_space<vmem>>, vector<34x128xbf16>
    %c2_26 = arith.constant 2 : index
    %c0_27 = arith.constant 0 : index
    %c0_28 = arith.constant 0 : index
    %25 = vector.load %arg2[%c2_26, %c0_27, %c0_28] : memref<3x128x128xbf16, #tpu.memory_space<vmem>>, vector<1x128x128xbf16>
    %26 = vector.shape_cast %25 : vector<1x128x128xbf16> to vector<128x128xbf16>
    %cst_29 = arith.constant dense<0.000000e+00> : vector<34x128xf32>
    %27 = tpu.matmul %24, %26, %cst_29 {dimension_numbers = #tpu.dot_dimension_numbers<[1], [0], [0], [1], [0, 0, 1, 1], [], []>} : vector<34x128xbf16>, vector<128x128xbf16>, vector<34x128xf32> -> vector<34x128xf32>
    %28 = arith.addf %23, %27 : vector<34x128xf32>
    %c0_30 = arith.constant 0 : index
    %c0_31 = arith.constant 0 : index
    %29 = vector.load %arg3[%c0_30, %c0_31] : memref<1x128xf32, #tpu.memory_space<vmem>>, vector<1x128xf32>
    %30 = vector.broadcast %29 : vector<1x128xf32> to vector<34x128xf32>
    %31 = arith.mulf %28, %30 : vector<34x128xf32>
    %c0_32 = arith.constant 0 : index
    %c0_33 = arith.constant 0 : index
    %32 = vector.load %arg4[%c0_32, %c0_33] : memref<1x128xf32, #tpu.memory_space<vmem>>, vector<1x128xf32>
    %33 = vector.broadcast %32 : vector<1x128xf32> to vector<34x128xf32>
    %34 = arith.addf %31, %33 : vector<34x128xf32>
    %cst_34 = arith.constant 0.000000e+00 : f32
    %35 = vector.broadcast %cst_34 : f32 to vector<34x128xf32>
    %36 = arith.maximumf %34, %35 : vector<34x128xf32>
    %37 = arith.truncf %36 : vector<34x128xf32> to vector<34x128xbf16>
    %c0_35 = arith.constant 0 : index
    %c0_36 = arith.constant 0 : index
    %38 = vector.load %arg10[%c0_35, %c0_36] : memref<36x128xbf16, #tpu.memory_space<vmem>>, vector<1x128xbf16>
    tpu.vector_store %arg10[%c0_35, %c0_36], %0 {strides = array<i32>} : memref<36x128xbf16, #tpu.memory_space<vmem>>, vector<1x128xbf16>,
    %39 = vector.extract_strided_slice %37 {offsets = [0, 0], sizes = [16, 128], strides = [1, 1]} : vector<34x128xbf16> to vector<16x128xbf16>
    %c1_37 = arith.constant 1 : index
    %c0_38 = arith.constant 0 : index
    %40 = vector.load %arg10[%c1_37, %c0_38] : memref<36x128xbf16, #tpu.memory_space<vmem>>, vector<16x128xbf16>
    tpu.vector_store %arg10[%c1_37, %c0_38], %39 {strides = array<i32>} : memref<36x128xbf16, #tpu.memory_space<vmem>>, vector<16x128xbf16>,
    %c17_39 = arith.constant 17 : index
    %c0_40 = arith.constant 0 : index
    %41 = vector.load %arg10[%c17_39, %c0_40] : memref<36x128xbf16, #tpu.memory_space<vmem>>, vector<1x128xbf16>
    tpu.vector_store %arg10[%c17_39, %c0_40], %0 {strides = array<i32>} : memref<36x128xbf16, #tpu.memory_space<vmem>>, vector<1x128xbf16>,
    %c18_41 = arith.constant 18 : index
    %c0_42 = arith.constant 0 : index
    %42 = vector.load %arg10[%c18_41, %c0_42] : memref<36x128xbf16, #tpu.memory_space<vmem>>, vector<1x128xbf16>
    tpu.vector_store %arg10[%c18_41, %c0_42], %0 {strides = array<i32>} : memref<36x128xbf16, #tpu.memory_space<vmem>>, vector<1x128xbf16>,
    %43 = vector.extract_strided_slice %37 {offsets = [18, 0], sizes = [16, 128], strides = [1, 1]} : vector<34x128xbf16> to vector<16x128xbf16>
    %c19_43 = arith.constant 19 : index
    %c0_44 = arith.constant 0 : index
    %44 = vector.load %arg10[%c19_43, %c0_44] : memref<36x128xbf16, #tpu.memory_space<vmem>>, vector<16x128xbf16>
    tpu.vector_store %arg10[%c19_43, %c0_44], %43 {strides = array<i32>} : memref<36x128xbf16, #tpu.memory_space<vmem>>, vector<16x128xbf16>,
    %c35_45 = arith.constant 35 : index
    %c0_46 = arith.constant 0 : index
    %45 = vector.load %arg10[%c35_45, %c0_46] : memref<36x128xbf16, #tpu.memory_space<vmem>>, vector<1x128xbf16>
    tpu.vector_store %arg10[%c35_45, %c0_46], %0 {strides = array<i32>} : memref<36x128xbf16, #tpu.memory_space<vmem>>, vector<1x128xbf16>,
    %cst_47 = arith.constant 0.000000e+00 : f32
    %46 = vector.broadcast %cst_47 : f32 to vector<34x128xf32>
    %c0_48 = arith.constant 0 : index
    %c0_49 = arith.constant 0 : index
    %47 = vector.load %arg10[%c0_48, %c0_49] : memref<36x128xbf16, #tpu.memory_space<vmem>>, vector<34x128xbf16>
    %c0_50 = arith.constant 0 : index
    %c0_51 = arith.constant 0 : index
    %c0_52 = arith.constant 0 : index
    %48 = vector.load %arg5[%c0_50, %c0_51, %c0_52] : memref<3x128x128xbf16, #tpu.memory_space<vmem>>, vector<1x128x128xbf16>
    %49 = vector.shape_cast %48 : vector<1x128x128xbf16> to vector<128x128xbf16>
    %cst_53 = arith.constant dense<0.000000e+00> : vector<34x128xf32>
    %50 = tpu.matmul %47, %49, %cst_53 {dimension_numbers = #tpu.dot_dimension_numbers<[1], [0], [0], [1], [0, 0, 1, 1], [], []>} : vector<34x128xbf16>, vector<128x128xbf16>, vector<34x128xf32> -> vector<34x128xf32>
    %51 = arith.addf %46, %50 : vector<34x128xf32>
    %c1_54 = arith.constant 1 : index
    %c0_55 = arith.constant 0 : index
    %52 = vector.load %arg10[%c1_54, %c0_55] : memref<36x128xbf16, #tpu.memory_space<vmem>>, vector<34x128xbf16>
    %c1_56 = arith.constant 1 : index
    %c0_57 = arith.constant 0 : index
    %c0_58 = arith.constant 0 : index
    %53 = vector.load %arg5[%c1_56, %c0_57, %c0_58] : memref<3x128x128xbf16, #tpu.memory_space<vmem>>, vector<1x128x128xbf16>
    %54 = vector.shape_cast %53 : vector<1x128x128xbf16> to vector<128x128xbf16>
    %cst_59 = arith.constant dense<0.000000e+00> : vector<34x128xf32>
    %55 = tpu.matmul %52, %54, %cst_59 {dimension_numbers = #tpu.dot_dimension_numbers<[1], [0], [0], [1], [0, 0, 1, 1], [], []>} : vector<34x128xbf16>, vector<128x128xbf16>, vector<34x128xf32> -> vector<34x128xf32>
    %56 = arith.addf %51, %55 : vector<34x128xf32>
    %c2_60 = arith.constant 2 : index
    %c0_61 = arith.constant 0 : index
    %57 = vector.load %arg10[%c2_60, %c0_61] : memref<36x128xbf16, #tpu.memory_space<vmem>>, vector<34x128xbf16>
    %c2_62 = arith.constant 2 : index
    %c0_63 = arith.constant 0 : index
    %c0_64 = arith.constant 0 : index
    %58 = vector.load %arg5[%c2_62, %c0_63, %c0_64] : memref<3x128x128xbf16, #tpu.memory_space<vmem>>, vector<1x128x128xbf16>
    %59 = vector.shape_cast %58 : vector<1x128x128xbf16> to vector<128x128xbf16>
    %cst_65 = arith.constant dense<0.000000e+00> : vector<34x128xf32>
    %60 = tpu.matmul %57, %59, %cst_65 {dimension_numbers = #tpu.dot_dimension_numbers<[1], [0], [0], [1], [0, 0, 1, 1], [], []>} : vector<34x128xbf16>, vector<128x128xbf16>, vector<34x128xf32> -> vector<34x128xf32>
    %61 = arith.addf %56, %60 : vector<34x128xf32>
    %c0_66 = arith.constant 0 : index
    %c0_67 = arith.constant 0 : index
    %62 = vector.load %arg6[%c0_66, %c0_67] : memref<1x128xf32, #tpu.memory_space<vmem>>, vector<1x128xf32>
    %63 = vector.broadcast %62 : vector<1x128xf32> to vector<34x128xf32>
    %64 = arith.mulf %61, %63 : vector<34x128xf32>
    %c0_68 = arith.constant 0 : index
    %c0_69 = arith.constant 0 : index
    %65 = vector.load %arg7[%c0_68, %c0_69] : memref<1x128xf32, #tpu.memory_space<vmem>>, vector<1x128xf32>
    %66 = vector.broadcast %65 : vector<1x128xf32> to vector<34x128xf32>
    %67 = arith.addf %64, %66 : vector<34x128xf32>
    %68 = vector.extract_strided_slice %67 {offsets = [0, 0], sizes = [16, 128], strides = [1, 1]} : vector<34x128xf32> to vector<16x128xf32>
    %c0_70 = arith.constant 0 : index
    %c0_71 = arith.constant 0 : index
    %c0_72 = arith.constant 0 : index
    %69 = vector.load %arg1[%c0_70, %c0_71, %c0_72] : memref<2x16x128xf32, #tpu.memory_space<vmem>>, vector<1x16x128xf32>
    %70 = vector.shape_cast %69 : vector<1x16x128xf32> to vector<16x128xf32>
    %71 = arith.addf %68, %70 : vector<16x128xf32>
    %cst_73 = arith.constant 0.000000e+00 : f32
    %72 = vector.broadcast %cst_73 : f32 to vector<16x128xf32>
    %73 = arith.maximumf %71, %72 : vector<16x128xf32>
    %c0_74 = arith.constant 0 : index
    %c0_75 = arith.constant 0 : index
    %c0_76 = arith.constant 0 : index
    %74 = vector.load %arg8[%c0_74, %c0_75, %c0_76] : memref<2x16x128xf32, #tpu.memory_space<vmem>>, vector<1x16x128xf32>
    %75 = vector.shape_cast %74 : vector<1x16x128xf32> to vector<16x128xf32>
    %76 = vector.shape_cast %73 : vector<16x128xf32> to vector<1x16x128xf32>
    tpu.vector_store %arg8[%c0_74, %c0_75, %c0_76], %76 {strides = array<i32>} : memref<2x16x128xf32, #tpu.memory_space<vmem>>, vector<1x16x128xf32>,
    %77 = vector.extract_strided_slice %67 {offsets = [18, 0], sizes = [16, 128], strides = [1, 1]} : vector<34x128xf32> to vector<16x128xf32>
    %c1_77 = arith.constant 1 : index
    %c0_78 = arith.constant 0 : index
    %c0_79 = arith.constant 0 : index
    %78 = vector.load %arg1[%c1_77, %c0_78, %c0_79] : memref<2x16x128xf32, #tpu.memory_space<vmem>>, vector<1x16x128xf32>
    %79 = vector.shape_cast %78 : vector<1x16x128xf32> to vector<16x128xf32>
    %80 = arith.addf %77, %79 : vector<16x128xf32>
    %cst_80 = arith.constant 0.000000e+00 : f32
    %81 = vector.broadcast %cst_80 : f32 to vector<16x128xf32>
    %82 = arith.maximumf %80, %81 : vector<16x128xf32>
    %c1_81 = arith.constant 1 : index
    %c0_82 = arith.constant 0 : index
    %c0_83 = arith.constant 0 : index
    %83 = vector.load %arg8[%c1_81, %c0_82, %c0_83] : memref<2x16x128xf32, #tpu.memory_space<vmem>>, vector<1x16x128xf32>
    %84 = vector.shape_cast %83 : vector<1x16x128xf32> to vector<16x128xf32>
    %85 = vector.shape_cast %82 : vector<16x128xf32> to vector<1x16x128xf32>
    tpu.vector_store %arg8[%c1_81, %c0_82, %c0_83], %85 {strides = array<i32>} : memref<2x16x128xf32, #tpu.memory_space<vmem>>, vector<1x16x128xf32>,
    return
  }
  func.func @transform_0(%arg0: i32) -> (i32, i32, i32) {
    %c0_i32 = arith.constant 0 : i32
    %c0_i32_0 = arith.constant 0 : i32
    %c0_i32_1 = arith.constant 0 : i32
    return %arg0, %c0_i32, %c0_i32_0 : i32, i32, i32
  }
  func.func @transform_1(%arg0: i32) -> (i32, i32, i32) {
    %c0_i32 = arith.constant 0 : i32
    %c0_i32_0 = arith.constant 0 : i32
    %c0_i32_1 = arith.constant 0 : i32
    %c0_i32_2 = arith.constant 0 : i32
    return %c0_i32, %c0_i32_0, %c0_i32_1 : i32, i32, i32
  }
  func.func @transform_2(%arg0: i32) -> (i32, i32) {
    %c0_i32 = arith.constant 0 : i32
    %c0_i32_0 = arith.constant 0 : i32
    %c0_i32_1 = arith.constant 0 : i32
    return %c0_i32, %c0_i32_0 : i32, i32
  }
  func.func @transform_3(%arg0: i32) -> (i32, i32) {
    %c0_i32 = arith.constant 0 : i32
    %c0_i32_0 = arith.constant 0 : i32
    %c0_i32_1 = arith.constant 0 : i32
    return %c0_i32, %c0_i32_0 : i32, i32
  }
  func.func @transform_4(%arg0: i32) -> (i32, i32, i32) {
    %c0_i32 = arith.constant 0 : i32
    %c0_i32_0 = arith.constant 0 : i32
    %c0_i32_1 = arith.constant 0 : i32
    %c0_i32_2 = arith.constant 0 : i32
    return %c0_i32, %c0_i32_0, %c0_i32_1 : i32, i32, i32
  }
  func.func @transform_5(%arg0: i32) -> (i32, i32) {
    %c0_i32 = arith.constant 0 : i32
    %c0_i32_0 = arith.constant 0 : i32
    %c0_i32_1 = arith.constant 0 : i32
    return %c0_i32, %c0_i32_0 : i32, i32
  }
  func.func @transform_6(%arg0: i32) -> (i32, i32) {
    %c0_i32 = arith.constant 0 : i32
    %c0_i32_0 = arith.constant 0 : i32
    %c0_i32_1 = arith.constant 0 : i32
    return %c0_i32, %c0_i32_0 : i32, i32
  }
  func.func @transform_7(%arg0: i32) -> (i32, i32, i32) {
    %c0_i32 = arith.constant 0 : i32
    %c0_i32_0 = arith.constant 0 : i32
    %c0_i32_1 = arith.constant 0 : i32
    return %arg0, %c0_i32, %c0_i32_0 : i32, i32, i32
  }
}

</mosaic_0001>

<bundles_post_ra>
// kernel: basic_block_forward.1
= control target key start
LH: loop header
LB: loop body
LE: loop exit
PB: predicated region body
PF: predicated region fallthrough
CT: control target
= control target key end

     0   :  { %v1663_v0 = vmov 0.0   ;;  %vm1664_vm0 = vmmov 0   ;;  %vm27_vm1 = vcmask 1040384   ;;  %vm28_vm2 = vsmask.f32 256  ;;  %s2137_s1 = inlined_call_operand.vmem [shape: bf16[3,128,128], index: 1, kind: input, shape index: {}]   ;;  %s2138_s0 = inlined_call_operand.vmem [shape: f32[2,16,128], index: 0, kind: input, shape index: {}]   ;;  %s2139_s4 = inlined_call_operand.vmem [shape: bf16[3,128,128], index: 4, kind: input, shape index: {}]   ;;  %s2140_s2 = inlined_call_operand.vmem [shape: f32[1,128], index: 2, kind: input, shape index: {}]   ;;  %s2141_s3 = inlined_call_operand.vmem [shape: f32[1,128], index: 3, kind: input, shape index: {}]   ;;  %s2142_s5 = inlined_call_operand.vmem [shape: f32[1,128], index: 5, kind: input, shape index: {}]   ;;  %s2143_s6 = inlined_call_operand.vmem [shape: f32[1,128], index: 6, kind: input, shape index: {}]   ;;  %s2144_s7 = inlined_call_operand.vmem [shape: f32[2,16,128], index: 7, kind: output, shape index: {}]  }
   0x1   :  { %1387 = vmatprep.subr.bf16.mxu0 %v1663_v0  ;;  %v1605_v1 = vld [vmem:[%s2137_s1 + $0x40] sm:$0xff]   ;;  %1403 = vmatprep.mubr.msk.bf16.mxu0 %vm1664_vm0, %v1663_v0  ;;  %v1606_v2 = vld [vmem:[%s2137_s1 + $0x48] sm:$0xff]   ;;  %v1607_v3 = vld [vmem:[%s2137_s1 + $0x50] sm:$0xff]   ;;  %vm63_vm4 = vcmask 1043456   ;;  %vm77_vm5 = vcmask 1041409   ;;  %vm116_vm6 = vcmask 1043457  }
   0x2   :  { %1471 = vmatprep.subr.bf16.mxu1 %v1663_v0  ;;  %1487 = vmatprep.mubr.msk.bf16.mxu1 %vm1664_vm0, %v1663_v0  ;;  %v1608_v4 = vld [vmem:[%s2137_s1 + $0x58] sm:$0xff]   ;;  %vm1727_vm3 = vmand %vm27_vm1, %vm28_vm2  ;;  %v30_v6 = vld [vmem:[#allocation2] sm:$0x1]  ;;  %vm41_vm7 = vsmask.f32 4368  ;;  %vm123_vm10 = vcmask 1041408  }
   0x3   :  { %1388 = vmatpush3.bf16.msra.mxu0 %v1605_v1  ;;  %v1734_v7 = vld [vmem:[%s2138_s0] sm:$0xff]  ;;  %v31_v8 = vsel %vm1727_vm3, 0, %v30_v6  ;;  %v1741_v9 = vld [vmem:[%s2138_s0 + $0x8] sm:$0xff]  ;;  %vm64_vm8 = vsmask.f32 7938  ;;  %v1750_v13 = vld [vmem:[%s2138_s0 + $0x10] sm:$0xff] }
   0x4   :  { %1389 = vmatprep.subr.bf16.mxu0 %v1663_v0  ;;  %v1312_v10 = vpack.c.bf16 %v1734_v7, %v1734_v7  ;;  %32 = vst [vmem:[#allocation2] sm:$0x1] %v31_v8  ;;  %v1313_v11 = vpack.c.bf16 %v1741_v9, %v1741_v9  ;;  %vm78_vm9 = vsmask.f32 1280  ;;  %v80_v12 = vld [vmem:[#allocation2 + $0x8] sm:$0x2]  ;;  %v1314_v17 = vpack.c.bf16 %v1750_v13, %v1750_v13  ;;  %vm1770_vm14 = vmor %vm28_vm2, %vm41_vm7 }
   0x5   :  { %v1756_v16 = vld [vmem:[%s2138_s0 + $0x18] sm:$0xff]  ;;  %vm92_vm11 = vsmask.f32 5392  ;;  %vm1762_vm12 = vmand %vm77_vm5, %vm78_vm9  ;;  %vm117_vm13 = vsmask.f32 7942  ;;  %v1609_v27 = vld [vmem:[%s2137_s1 + $0x60] sm:$0xff]  }
   0x6   :  { %v44_v14 = vshrl.u32 %v1312_v10, 16  ;;  %v47_v15 = vshll.u32 %v1312_v10, 16  ;;  %v52_v18 = vshrl.u32 %v1313_v11, 16  ;;  %v55_v19 = vshll.u32 %v1313_v11, 16  ;;  %vm1781_vm15 = vmand %vm63_vm4, %vm64_vm8  ;;  %v70_v30 = vld [vmem:[#allocation2 + $0x8] sm:$0x1] }
   0x7   :  { %1390 = vmatpush3.bf16.msra.mxu0 %v1606_v2  ;;  %v1315_v21 = vpack.c.bf16 %v1756_v16, %v1756_v16  ;;  %v81_v24 = vsel %vm1762_vm12, 0, %v80_v12  ;;  %v95_v25 = vshrl.u32 %v1314_v17, 16  ;;  %v98_v26 = vshll.u32 %v1314_v17, 16  ;;  %vm1788_vm2 = vmor %vm78_vm9, %vm92_vm11  ;;  %v1610_v38 = vld [vmem:[%s2137_s1 + $0x68] sm:$0xff]   ;;  %v125_v50 = vld [vmem:[#allocation2 + $0x10] sm:$0x3] }
   0x8   :  { %1391 = vmatprep.subr.bf16.mxu0 %v1663_v0  ;;  %v46_v23 = vrot.slane %v44_v14, 7  ;;  %v54_v28 = vrot.slane %v52_v18, 7  ;;  %82 = vst [vmem:[#allocation2 + $0x8] sm:$0x2] %v81_v24  ;;  %vm1797_vm4 = vmand %vm116_vm6, %vm117_vm13  ;;  %v1611_v56 = vld [vmem:[%s2137_s1 + $0x70] sm:$0xff]   ;;  %v1612_v60 = vld [vmem:[%s2137_s1 + $0x78] sm:$0xff]  }
   0x9   :  { %v104_v31 = vshrl.u32 %v1315_v21, 16  ;;  %v107_v32 = vshll.u32 %v1315_v21, 16  ;;  %v97_v36 = vrot.slane %v95_v25, 6  ;;  %v100_v37 = vrot.slane %v98_v26, 7  ;;  %vm1810_vm6 = vmand %vm123_vm10, %vm78_vm9  ;;  %v1638_v20 = vld [vmem:[%s2139_s4 + $0x60] sm:$0xff]  }
   0xa   :  { %v49_v33 = vor.u32 %v47_v15, %v46_v23  ;;  %v50_v34 = vrot.slane %v46_v23, 4  ;;  %v57_v39 = vor.u32 %v55_v19, %v54_v28  ;;  %v59_v40 = vrot.slane %v54_v28, 4  ;;  %vm1826_vm7 = vmand %vm27_vm1, %vm64_vm8  ;;  %v1615_v23 = vld [vmem:[%s2137_s1] sm:$0xff]  }
   0xb   :  { %1392 = vmatpush3.bf16.msra.mxu0 %v1607_v3  ;;  %v106_v41 = vrot.slane %v104_v31, 6  ;;  %v109_v42 = vrot.slane %v107_v32, 7  ;;  %v66_v44 = vld [vmem:[#allocation2] sm:$0xf]  ;;  %v101_v45 = vor.u32 %v100_v37, %v97_v36  ;;  %vm1840_vm1 = vmand %vm77_vm5, %vm117_vm13  ;;  %vm446_vm5 = vcmask 1046528   ;;  %v1616_v32 = vld [vmem:[%s2137_s1 + $0x8] sm:$0xff]  }
   0xc   :  { %1393 = vmatprep.subr.bf16.mxu0 %v1663_v0  ;;  %v58_v46 = vsel %vm1770_vm14, %v50_v34, %v57_v39  ;;  %v67_v47 = vsel %vm1781_vm15, %v49_v33, %v66_v44  ;;  %v71_v48 = vsel %vm1727_vm3, %v59_v40, %v70_v30  ;;  %vm184_vm8 = vsmask.f32 7424  ;;  %v1617_v36 = vld [vmem:[%s2137_s1 + $0x10] sm:$0xff]   ;;  %v1618_v39 = vld [vmem:[%s2137_s1 + $0x18] sm:$0xff]   ;;  %v1644_v22 = vld [vmem:[%s2139_s4] sm:$0xff]  }
   0xd   :  { %v110_v49 = vor.u32 %v109_v42, %v106_v41  ;;  %68 = vst [vmem:[#allocation2] sm:$0xf] %v67_v47  ;;  %69 = vst [vmem:[#allocation2 + $0x4] sm:$0xf] %v58_v46  ;;  %v102_v51 = vrot.slane %v101_v45, 4  ;;  %v1620_v41 = vld [vmem:[%s2137_s1 + $0x20] sm:$0xff]  }
   0xe   :  { %72 = vst [vmem:[#allocation2 + $0x8] sm:$0x1] %v71_v48  ;;  %v1621_v42 = vld [vmem:[%s2137_s1 + $0x28] sm:$0xff]   ;;  %v1622_v44 = vld [vmem:[%s2137_s1 + $0x30] sm:$0xff]   ;;  %v1624_v46 = vld [vmem:[%s2137_s1 + $0x80] sm:$0xff]  }
   0xf   :  { %1394 = vmatpush3.bf16.msra.mxu0 %v1608_v4  ;;  %v112_v53 = vrot.slane %v110_v49, 4  ;;  %v111_v54 = vsel %vm1788_vm2, %v102_v51, %v110_v49  ;;  %v119_v55 = vld [vmem:[#allocation2 + $0x8] sm:$0xe]  ;;  %v1626_v48 = vld [vmem:[%s2137_s1 + $0x90] sm:$0xff]   ;;  %v1627_v49 = vld [vmem:[%s2137_s1 + $0x98] sm:$0xff]  }
  0x10   :  { %1395 = vmatprep.subr.bf16.mxu0 %v1663_v0  ;;  %v120_v57 = vsel %vm1797_vm4, %v101_v45, %v119_v55  ;;  %122 = vst [vmem:[#allocation2 + $0xc] sm:$0xf] %v111_v54  ;;  %v1623_v45 = vld [vmem:[%s2137_s1 + $0x38] sm:$0xff]   ;;  %v1625_v47 = vld [vmem:[%s2137_s1 + $0x88] sm:$0xff]   ;;  %v1628_v51 = vld [vmem:[%s2137_s1 + $0xa0] sm:$0xff]  }
  0x11   :  { %v126_v58 = vsel %vm1810_vm6, %v112_v53, %v125_v50  ;;  %121 = vst [vmem:[#allocation2 + $0x8] sm:$0xe] %v120_v57  ;;  %v1629_v53 = vld [vmem:[%s2137_s1 + $0xa8] sm:$0xff]   ;;  %v1631_v54 = vld [vmem:[%s2137_s1 + $0xb0] sm:$0xff]   ;;  %v1632_v55 = vld [vmem:[%s2137_s1 + $0xb8] sm:$0xff]  }
  0x12   :  { %127 = vst [vmem:[#allocation2 + $0x10] sm:$0x3] %v126_v58  ;;  %v1634_v58 = vld [vmem:[%s2139_s4 + $0x40] sm:$0xff]   ;;  %v1647_v3 = vld [vmem:[%s2139_s4 + $0x18] sm:$0xff]  }
  0x13   :  { %1396 = vmatpush3.bf16.msra.mxu0 %v1609_v27  ;;  %1472 = vmatpush3.bf16.msra.mxu1 %v1634_v58 }
  0x14   :  { %1397 = vmatprep.subr.bf16.mxu0 %v1663_v0  ;;  %v132_v62 = vld [vmem:[#allocation2] sm:$0xf]  ;;  %v133_v63 = vld [vmem:[#allocation2 + $0x4] sm:$0xf]  ;;  %1473 = vmatprep.subr.bf16.mxu1 %v1663_v0 }
  0x15   :  { %v74_v61 = vld [vmem:[#allocation2 + $0x8] sm:$0x1]  ;;  %v1836_v2 = vcombine.low %v132_v62, %v133_v63  ;;  %v425_v12 = vld [vmem:[#allocation2] sm:$0xe] }
  0x16   :  { %v75_v1 = vsel %vm1826_vm7, 0, %v74_v61  ;;  %v1228_v15 = vcombine.low %v425_v12, %v133_v63  ;;  %v634_v61 = vld [vmem:[#allocation3 + $0x8] sm:$0x2]  ;;  %v1636_v63 = vld [vmem:[%s2139_s4 + $0x50] sm:$0xff]  }
  0x17   :  { %1398 = vmatpush3.bf16.msra.mxu0 %v1610_v38  ;;  %76 = vst [vmem:[#allocation2 + $0x8] sm:$0x1] %v75_v1  ;;  %v188_v4 = vshll.u32 %v1836_v2, 16  ;;  %v186_v10 = vshrl.u32 %v1836_v2, 16  ;;  %v635_v62 = vsel %vm1762_vm12, 0, %v634_v61  ;;  %v1637_v1 = vld [vmem:[%s2139_s4 + $0x58] sm:$0xff]  }
  0x18   :  { %1399 = vmatprep.subr.bf16.mxu0 %v1663_v0  ;;  %v447_v19 = vrot.slane %v1228_v15, 1  ;;  %636 = vst [vmem:[#allocation3 + $0x8] sm:$0x2] %v635_v62 }
  0x19   :  { %v129_v6 = vld [vmem:[#allocation2 + $0x10] sm:$0x2]  ;;  %v190_v11 = vrot.slane %v188_v4, 1  ;;  %v1852_v26 = vld [vmem:[#allocation2 + $0x10] ss:$0 sps:$4 sm:$0x33]  }
  0x1a   :  { %v130_v8 = vsel %vm1840_vm1, 0, %v129_v6  ;;  %v201_v30 = vshll.u32 %v1852_v26, 16  ;;  %v450_v31 = vrot.slane %v1852_v26, 1  ;;  %v205_v38 = vshrl.u32 %v1852_v26, 16  ;;  %v1640_v4 = vld [vmem:[%s2139_s4 + $0x70] sm:$0xff]   ;;  %v1641_v6 = vld [vmem:[%s2139_s4 + $0x78] sm:$0xff]  }
  0x1b   :  { %1400 = vmatpush3.bf16.msra.mxu0 %v1611_v56  ;;  %131 = vst [vmem:[#allocation2 + $0x10] sm:$0x2] %v130_v8  ;;  %v191_v17 = vor.u32 %v190_v11, %v186_v10  ;;  %v1630_v50 = vld [vmem:[#allocation2 + $0x10] ss:$0 sps:$4 sm:$0x11]  }
  0x1c   :  { %1401 = vmatprep.subr.bf16.mxu0 %v1663_v0  ;;  %v203_v34 = vrot.slane %v201_v30, 1  ;;  %v596_v56 = vld [vmem:[#allocation3] sm:$0x1]  ;;  %v1237_v8 = vld [vmem:[%s2140_s2] ss:$0 sm:$0xff] }
  0x1d   :  { %v597_v57 = vsel %vm1727_vm3, 0, %v596_v56  ;;  %v1238_v11 = vld [vmem:[%s2141_s3] ss:$0 sm:$0xff] }
  0x1e   :  { %v1614_v14 = vld [vmem:[#allocation2 + $0x8] sm:$0xff]   ;;  %v207_v40 = vor.u32 %v205_v38, %v203_v34  ;;  %598 = vst [vmem:[#allocation3] sm:$0x1] %v597_v57 }
  0x1f   :  { %1402 = vmatpush3.bf16.msra.mxu0 %v1612_v60  ;;  %v193_v18 = vshll.u32 %v1614_v14, 16  ;;  %v448_v21 = vrot.slane %v1614_v14, 1  ;;  %v197_v24 = vshrl.u32 %v1614_v14, 16  ;;  %v1635_v60 = vld [vmem:[%s2139_s4 + $0x48] sm:$0xff]  }
  0x20   :  { %1415 = vmatprep.subr.bf16.mxu0 %v1663_v0  ;;  %1474 = vmatpush3.bf16.msra.mxu1 %v1635_v60 }
  0x21   :  { %v195_v25 = vrot.slane %v193_v18, 1  ;;  %v1855_v27 = vsel %vm446_vm5, %v447_v19, %v448_v21  ;;  %v451_v35 = vsel %vm446_vm5, %v448_v21, %v450_v31  ;;  %1475 = vmatprep.subr.bf16.mxu1 %v1663_v0 }
  0x23   :  { %v196_v28 = vsel %vm184_vm8, %v191_v17, %v195_v25  ;;  %v199_v33 = vor.u32 %v197_v24, %v195_v25 }
  0x24   :  { %1404 = vmatmul.mubr.bf16.vlgmr.msra.gmra.mrb[0].mxu0 %v196_v28  ;;  %1476 = vmatpush3.bf16.msra.mxu1 %v1636_v63 }
  0x25   :  { %1416 = vmatpush3.bf16.msra.mxu0 %v1615_v23  ;;  %1407 = vmatprep.mubr.msk.bf16.mxu0 %vm1664_vm0, %v1663_v0  ;;  %v204_v37 = vsel %vm184_vm8, %v199_v33, %v203_v34  ;;  %v624_v38 = vld [vmem:[#allocation3] sm:$0xf] }
  0x26   :  { %1417 = vmatprep.subr.bf16.mxu0 %v1663_v0  ;;  %1477 = vmatprep.subr.bf16.mxu1 %v1663_v0 }
  0x28   :  { %1478 = vmatpush3.bf16.msra.mxu1 %v1637_v1 }
  0x29   :  { %1418 = vmatpush3.bf16.msra.mxu0 %v1616_v32  ;;  %1479 = vmatprep.subr.bf16.mxu1 %v1663_v0 }
  0x2a   :  { %1419 = vmatprep.subr.bf16.mxu0 %v1663_v0 }
  0x2c   :  { %1408 = vmatmul.mubr.bf16.gmra.mrb[4].mxu0 %v204_v37  ;;  %1480 = vmatpush3.bf16.msra.mxu1 %v1638_v20  ;;  %v673_v20 = vld [vmem:[#allocation3 + $0x8] sm:$0xe] }
  0x2d   :  { %1420 = vmatpush3.bf16.msra.mxu0 %v1617_v36  ;;  %1411 = vmatprep.mubr.msk.bf16.mxu0 %vm1664_vm0, %v1663_v0 }
  0x2e   :  { %1421 = vmatprep.subr.bf16.mxu0 %v1663_v0  ;;  %1481 = vmatprep.subr.bf16.mxu1 %v1663_v0 }
  0x31   :  { %1422 = vmatpush3.bf16.msra.mxu0 %v1618_v39 }
  0x32   :  { %1423 = vmatprep.subr.bf16.mxu0 %v1663_v0 }
  0x34   :  { %1412 = vmatmul.mubr.bf16.gmra.mrb[8].mxu0 %v207_v40 }
  0x35   :  { %1424 = vmatpush3.bf16.msra.mxu0 %v1620_v41  ;;  %1431 = vmatprep.mubr.msk.bf16.mxu0 %vm1664_vm0, %v1663_v0 }
  0x36   :  { %1425 = vmatprep.subr.bf16.mxu0 %v1663_v0 }
  0x39   :  { %1426 = vmatpush3.bf16.msra.mxu0 %v1621_v42 }
  0x3a   :  { %1427 = vmatprep.subr.bf16.mxu0 %v1663_v0 }
  0x3d   :  { %1428 = vmatpush3.bf16.msra.mxu0 %v1622_v44 }
  0x3e   :  { %1429 = vmatprep.subr.bf16.mxu0 %v1663_v0 }
  0x41   :  { %1430 = vmatpush3.bf16.msra.mxu0 %v1623_v45 }
  0x42   :  { %1443 = vmatprep.subr.bf16.mxu0 %v1663_v0 }
  0x44   :  { %1432 = vmatmul.mubr.bf16.vlgmr.msra.gmra.mrb[0].mxu0 %v1836_v2  ;;  %v1639_v2 = vld [vmem:[%s2139_s4 + $0x68] sm:$0xff]  }
  0x45   :  { %1444 = vmatpush3.bf16.msra.mxu0 %v1624_v46  ;;  %1435 = vmatprep.mubr.msk.bf16.mxu0 %vm1664_vm0, %v1663_v0  ;;  %v628_v46 = vld [vmem:[#allocation3 + $0x8] sm:$0x1] }
  0x46   :  { %1445 = vmatprep.subr.bf16.mxu0 %v1663_v0  ;;  %1482 = vmatpush3.bf16.msra.mxu1 %v1639_v2 }
  0x47   :  { %1483 = vmatprep.subr.bf16.mxu1 %v1663_v0 }
  0x49   :  { %1446 = vmatpush3.bf16.msra.mxu0 %v1625_v47 }
  0x4a   :  { %1447 = vmatprep.subr.bf16.mxu0 %v1663_v0  ;;  %1484 = vmatpush3.bf16.msra.mxu1 %v1640_v4 }
  0x4b   :  { %1485 = vmatprep.subr.bf16.mxu1 %v1663_v0 }
  0x4c   :  { %1436 = vmatmul.mubr.bf16.gmra.mrb[4].mxu0 %v1614_v14 }
  0x4d   :  { %1448 = vmatpush3.bf16.msra.mxu0 %v1626_v48  ;;  %1439 = vmatprep.mubr.msk.bf16.mxu0 %vm1664_vm0, %v1663_v0 }
  0x4e   :  { %1449 = vmatprep.subr.bf16.mxu0 %v1663_v0  ;;  %1486 = vmatpush3.bf16.msra.mxu1 %v1641_v6 }
  0x4f   :  { %1499 = vmatprep.subr.bf16.mxu1 %v1663_v0 }
  0x51   :  { %1450 = vmatpush3.bf16.msra.mxu0 %v1627_v49 }
  0x52   :  { %1451 = vmatprep.subr.bf16.mxu0 %v1663_v0 }
  0x54   :  { %1440 = vmatmul.mubr.bf16.gmra.mrb[8].mxu0 %v1630_v50 }
  0x55   :  { %1452 = vmatpush3.bf16.msra.mxu0 %v1628_v51  ;;  %1459 = vmatprep.mubr.msk.bf16.mxu0 %vm1664_vm0, %v1663_v0 }
  0x56   :  { %1453 = vmatprep.subr.bf16.mxu0 %v1663_v0 }
  0x59   :  { %1454 = vmatpush3.bf16.msra.mxu0 %v1629_v53 }
  0x5a   :  { %1455 = vmatprep.subr.bf16.mxu0 %v1663_v0 }
  0x5d   :  { %1456 = vmatpush3.bf16.msra.mxu0 %v1631_v54 }
  0x5e   :  { %1457 = vmatprep.subr.bf16.mxu0 %v1663_v0 }
  0x61   :  { %1458 = vmatpush3.bf16.msra.mxu0 %v1632_v55 }
  0x64   :  { %1460 = vmatmul.mubr.bf16.vlgmr.msra.gmra.mrb[0].mxu0 %v1855_v27 }
  0x65   :  { %1463 = vmatprep.mubr.msk.bf16.mxu0 %vm1664_vm0, %v1663_v0 }
  0x6c   :  { %1464 = vmatmul.mubr.bf16.gmra.mrb[4].mxu0 %v451_v35 }
  0x6d   :  { %1467 = vmatprep.mubr.msk.bf16.mxu0 %vm1664_vm0, %v1663_v0 }
  0x74   :  { %1468 = vmatmul.mubr.bf16.gmra.mrb[8].mxu0 %v450_v31 }
 0x137   :  { %v537_v10 = vpop.f32.mrb[0].mxu0 }
 0x138   :  { %v571_v12 = vmul.f32 %v1237_v8, %v537_v10  ;;  %v1461_v14 = vpop.f32.mrb[1].mxu0 }
 0x139   :  { %v540_v15 = vpop.f32.mrb[2].mxu0 }
 0x13a   :  { %v583_v17 = vadd.f32 %v1238_v11, %v571_v12  ;;  %v572_v18 = vmul.f32 %v1237_v8, %v540_v15  ;;  %v1462_v19 = vpop.f32.mrb[3].mxu0 }
 0x13c   :  { %v588_v21 = vmax.f32 %v583_v17, 0.0  ;;  %v584_v23 = vadd.f32 %v1238_v11, %v572_v18 }
 0x13e   :  { %v1316_v24 = vpack.c.bf16 %v588_v21, %v588_v21  ;;  %v589_v25 = vmax.f32 %v584_v23, 0.0 }
 0x13f   :  { %v545_v26 = vpop.f32.mrb[4].mxu0 }
 0x140   :  { %v605_v27 = vshrl.u32 %v1316_v24, 16  ;;  %v1317_v28 = vpack.c.bf16 %v589_v25, %v589_v25  ;;  %v573_v30 = vmul.f32 %v1237_v8, %v545_v26  ;;  %v1465_v31 = vpop.f32.mrb[5].mxu0  ;;  %v608_v34 = vshll.u32 %v1316_v24, 16 }
 0x141   :  { %v548_v32 = vpop.f32.mrb[6].mxu0 }
 0x142   :  { %v607_v33 = vrot.slane %v605_v27, 7  ;;  %v613_v35 = vshrl.u32 %v1317_v28, 16  ;;  %v585_v36 = vadd.f32 %v1238_v11, %v573_v30  ;;  %v1466_v37 = vpop.f32.mrb[7].mxu0  ;;  %v574_v39 = vmul.f32 %v1237_v8, %v548_v32  ;;  %v677_v30 = vld [vmem:[#allocation3 + $0x10] sm:$0x3] }
 0x143   :  { %v616_v42 = vshll.u32 %v1317_v28, 16 }
 0x144   :  { %v610_v40 = vor.u32 %v608_v34, %v607_v33  ;;  %v615_v41 = vrot.slane %v613_v35, 7  ;;  %v590_v44 = vmax.f32 %v585_v36, 0.0  ;;  %v611_v45 = vrot.slane %v607_v33, 4 }
 0x145   :  { %v586_v47 = vadd.f32 %v1238_v11, %v574_v39 }
 0x146   :  { %v625_v48 = vsel %vm1781_vm15, %v610_v40, %v624_v38  ;;  %v618_v49 = vor.u32 %v616_v42, %v615_v41  ;;  %v620_v50 = vrot.slane %v615_v41, 4  ;;  %v1318_v51 = vpack.c.bf16 %v590_v44, %v590_v44 }
 0x147   :  { %626 = vst [vmem:[#allocation3] sm:$0xf] %v625_v48  ;;  %v591_v53 = vmax.f32 %v586_v47, 0.0  ;;  %v553_v54 = vpop.f32.mrb[8].mxu0  ;;  %v1645_v47 = vld [vmem:[%s2139_s4 + $0x8] sm:$0xff]   ;;  %v1646_v48 = vld [vmem:[%s2139_s4 + $0x10] sm:$0xff]  }
 0x148   :  { %v619_v55 = vsel %vm1770_vm14, %v611_v45, %v618_v49  ;;  %v629_v56 = vsel %vm1727_vm3, %v620_v50, %v628_v46  ;;  %v646_v57 = vshrl.u32 %v1318_v51, 16  ;;  %v1469_v58 = vpop.f32.mrb[9].mxu0  ;;  %v575_v61 = vmul.f32 %v1237_v8, %v553_v54 }
 0x149   :  { %627 = vst [vmem:[#allocation3 + $0x4] sm:$0xf] %v619_v55  ;;  %630 = vst [vmem:[#allocation3 + $0x8] sm:$0x1] %v629_v56  ;;  %v1319_v60 = vpack.c.bf16 %v591_v53, %v591_v53  ;;  %v556_v29 = vpop.f32.mrb[10].mxu0  ;;  %v649_v63 = vshll.u32 %v1318_v51, 16 }
 0x14a   :  { %v648_v62 = vrot.slane %v646_v57, 7  ;;  %v1470_v1 = vpop.f32.mrb[11].mxu0  ;;  %v587_v4 = vadd.f32 %v1238_v11, %v575_v61  ;;  %v1649_v55 = vld [vmem:[%s2139_s4 + $0x20] sm:$0xff]   ;;  %v1650_v57 = vld [vmem:[%s2139_s4 + $0x28] sm:$0xff]   ;;  %v1652_v29 = vld [vmem:[%s2139_s4 + $0x38] sm:$0xff]  }
 0x14b   :  { %v654_v2 = vshrl.u32 %v1319_v60, 16  ;;  %v657_v12 = vshll.u32 %v1319_v60, 16  ;;  %v1651_v60 = vld [vmem:[%s2139_s4 + $0x30] sm:$0xff]  }
 0x14c   :  { %v651_v6 = vor.u32 %v649_v63, %v648_v62  ;;  %v592_v14 = vmax.f32 %v587_v4, 0.0  ;;  %v652_v15 = vrot.slane %v648_v62, 4  ;;  %v1653_v62 = vld [vmem:[%s2139_s4 + $0x80] sm:$0xff]   ;;  %v1654_v63 = vld [vmem:[%s2139_s4 + $0x88] sm:$0xff]   ;;  %v1655_v1 = vld [vmem:[%s2139_s4 + $0x90] sm:$0xff]  }
 0x14d   :  { %v656_v10 = vrot.slane %v654_v2, 7  ;;  %v1658_v2 = vld [vmem:[%s2139_s4 + $0xa0] sm:$0xff]  }
 0x14e   :  { %v674_v5 = vsel %vm1797_vm4, %v651_v6, %v673_v20  ;;  %v1320_v18 = vpack.c.bf16 %v592_v14, %v592_v14  ;;  %v683_v24 = vld [vmem:[#allocation3] sm:$0xf]  ;;  %v1656_v20 = vld [vmem:[%s2139_s4 + $0x98] sm:$0xff]   ;;  %v1659_v6 = vld [vmem:[%s2139_s4 + $0xa8] sm:$0xff]  }
 0x14f   :  { %675 = vst [vmem:[#allocation3 + $0x8] sm:$0xe] %v674_v5  ;;  %v659_v17 = vor.u32 %v657_v12, %v656_v10  ;;  %v661_v27 = vrot.slane %v656_v10, 4  ;;  %v975_v32 = vld [vmem:[#allocation3] sm:$0xe]  ;;  %v1661_v12 = vld [vmem:[%s2139_s4 + $0xb8] sm:$0xff]  }
 0x150   :  { %v631_v19 = vld [vmem:[#allocation3 + $0x8] sm:$0x1]  ;;  %v684_v8 = vld [vmem:[#allocation3 + $0x4] sm:$0xf]  ;;  %v663_v11 = vshrl.u32 %v1320_v18, 16  ;;  %v666_v26 = vshll.u32 %v1320_v18, 16 }
 0x151   :  { %v632_v21 = vsel %vm1826_vm7, 0, %v631_v19  ;;  %v660_v23 = vsel %vm1770_vm14, %v652_v15, %v659_v17  ;;  %v1999_v25 = vcombine.low %v683_v24, %v684_v8  ;;  %v1296_v33 = vcombine.low %v975_v32, %v684_v8  ;;  %v1660_v10 = vld [vmem:[%s2139_s4 + $0xb0] sm:$0xff]   ;;  %v1305_v15 = vld [vmem:[%s2142_s5] ss:$0 sm:$0xff] }
 0x152   :  { %633 = vst [vmem:[#allocation3 + $0x8] sm:$0x1] %v632_v21  ;;  %676 = vst [vmem:[#allocation3 + $0xc] sm:$0xf] %v660_v23  ;;  %v665_v43 = vrot.slane %v663_v11, 7 }
 0x153   :  { %v738_v31 = vshll.u32 %v1999_v25, 16  ;;  %v736_v37 = vshrl.u32 %v1999_v25, 16  ;;  %v996_v39 = vrot.slane %v1296_v33, 1  ;;  %v1306_v18 = vld [vmem:[%s2143_s6] ss:$0 sm:$0xff] }
 0x154   :  { %v668_v28 = vor.u32 %v666_v26, %v665_v43 }
 0x155   :  { %v740_v36 = vrot.slane %v738_v31, 1 }
 0x156   :  { %v669_v59 = vsel %vm1770_vm14, %v661_v27, %v668_v28  ;;  %v1150_v28 = vrot.slane %v1750_v13, 6 }
 0x157   :  { %v678_v34 = vsel %vm1810_vm6, %v669_v59, %v677_v30  ;;  %v741_v41 = vor.u32 %v740_v36, %v736_v37  ;;  %v1151_v30 = vrot.slane %v1756_v16, 6 }
 0x158   :  { %679 = vst [vmem:[#allocation3 + $0x10] sm:$0x3] %v678_v34 }
 0x159   :  { %v2006_v35 = vld [vmem:[#allocation3 + $0x8] sm:$0xff]  }
 0x15a   :  { %v743_v38 = vshll.u32 %v2006_v35, 16  ;;  %v997_v40 = vrot.slane %v2006_v35, 1  ;;  %v747_v50 = vshrl.u32 %v2006_v35, 16 }
 0x15c   :  { %v745_v42 = vrot.slane %v743_v38, 1  ;;  %v2017_v52 = vsel %vm446_vm5, %v996_v39, %v997_v40 }
 0x15e   :  { %v746_v44 = vsel %vm184_vm8, %v741_v41, %v745_v42  ;;  %v749_v53 = vor.u32 %v747_v50, %v745_v42 }
 0x15f   :  { %v680_v45 = vld [vmem:[#allocation3 + $0x10] sm:$0x2]  ;;  %1488 = vmatmul.mubr.bf16.vlgmr.msra.gmra.mrb[0].mxu1 %v746_v44  ;;  %v2035_v49 = vld [vmem:[#allocation3 + $0x10] ss:$0 sps:$4 sm:$0x33]  }
 0x160   :  { %v681_v46 = vsel %vm1840_vm1, 0, %v680_v45  ;;  %1500 = vmatpush3.bf16.msra.mxu1 %v1644_v22  ;;  %1491 = vmatprep.mubr.msk.bf16.mxu1 %vm1664_vm0, %v1663_v0  ;;  %v751_v51 = vshll.u32 %v2035_v49, 16  ;;  %v755_v58 = vshrl.u32 %v2035_v49, 16  ;;  %v1657_v4 = vld [vmem:[#allocation3 + $0x10] ss:$0 sps:$4 sm:$0x11]  }
 0x161   :  { %682 = vst [vmem:[#allocation3 + $0x10] sm:$0x2] %v681_v46  ;;  %1501 = vmatprep.subr.bf16.mxu1 %v1663_v0  ;;  %v999_v14 = vrot.slane %v2035_v49, 1 }
 0x162   :  { %v753_v54 = vrot.slane %v751_v51, 1 }
 0x163   :  { %v1000_v5 = vsel %vm446_vm5, %v997_v40, %v999_v14 }
 0x164   :  { %1502 = vmatpush3.bf16.msra.mxu1 %v1645_v47  ;;  %v754_v56 = vsel %vm184_vm8, %v749_v53, %v753_v54  ;;  %v757_v61 = vor.u32 %v755_v58, %v753_v54 }
 0x165   :  { %1503 = vmatprep.subr.bf16.mxu1 %v1663_v0 }
 0x167   :  { %1492 = vmatmul.mubr.bf16.gmra.mrb[4].mxu1 %v754_v56 }
 0x168   :  { %1504 = vmatpush3.bf16.msra.mxu1 %v1646_v48  ;;  %1495 = vmatprep.mubr.msk.bf16.mxu1 %vm1664_vm0, %v1663_v0 }
 0x169   :  { %1505 = vmatprep.subr.bf16.mxu1 %v1663_v0 }
 0x16c   :  { %1506 = vmatpush3.bf16.msra.mxu1 %v1647_v3 }
 0x16d   :  { %1507 = vmatprep.subr.bf16.mxu1 %v1663_v0 }
 0x16f   :  { %1496 = vmatmul.mubr.bf16.gmra.mrb[8].mxu1 %v757_v61 }
 0x170   :  { %1508 = vmatpush3.bf16.msra.mxu1 %v1649_v55  ;;  %1515 = vmatprep.mubr.msk.bf16.mxu1 %vm1664_vm0, %v1663_v0 }
 0x171   :  { %1509 = vmatprep.subr.bf16.mxu1 %v1663_v0 }
 0x174   :  { %1510 = vmatpush3.bf16.msra.mxu1 %v1650_v57 }
 0x175   :  { %1511 = vmatprep.subr.bf16.mxu1 %v1663_v0 }
 0x178   :  { %1512 = vmatpush3.bf16.msra.mxu1 %v1651_v60 }
 0x179   :  { %1513 = vmatprep.subr.bf16.mxu1 %v1663_v0 }
 0x17c   :  { %1514 = vmatpush3.bf16.msra.mxu1 %v1652_v29 }
 0x17d   :  { %1527 = vmatprep.subr.bf16.mxu1 %v1663_v0 }
 0x17f   :  { %1516 = vmatmul.mubr.bf16.vlgmr.msra.gmra.mrb[0].mxu1 %v1999_v25 }
 0x180   :  { %1528 = vmatpush3.bf16.msra.mxu1 %v1653_v62  ;;  %1519 = vmatprep.mubr.msk.bf16.mxu1 %vm1664_vm0, %v1663_v0 }
 0x181   :  { %1529 = vmatprep.subr.bf16.mxu1 %v1663_v0 }
 0x184   :  { %1530 = vmatpush3.bf16.msra.mxu1 %v1654_v63 }
 0x185   :  { %1531 = vmatprep.subr.bf16.mxu1 %v1663_v0 }
 0x187   :  { %1520 = vmatmul.mubr.bf16.gmra.mrb[4].mxu1 %v2006_v35  ;;  %v1152_v35 = vsel %vm123_vm10, %v1150_v28, %v1151_v30 }
 0x188   :  { %1532 = vmatpush3.bf16.msra.mxu1 %v1655_v1  ;;  %1523 = vmatprep.mubr.msk.bf16.mxu1 %vm1664_vm0, %v1663_v0 }
 0x189   :  { %1533 = vmatprep.subr.bf16.mxu1 %v1663_v0 }
 0x18c   :  { %1534 = vmatpush3.bf16.msra.mxu1 %v1656_v20 }
 0x18d   :  { %1535 = vmatprep.subr.bf16.mxu1 %v1663_v0 }
 0x18f   :  { %1524 = vmatmul.mubr.bf16.gmra.mrb[8].mxu1 %v1657_v4 }
 0x190   :  { %1536 = vmatpush3.bf16.msra.mxu1 %v1658_v2  ;;  %1543 = vmatprep.mubr.msk.bf16.mxu1 %vm1664_vm0, %v1663_v0 }
 0x191   :  { %1537 = vmatprep.subr.bf16.mxu1 %v1663_v0 }
 0x194   :  { %1538 = vmatpush3.bf16.msra.mxu1 %v1659_v6 }
 0x195   :  { %1539 = vmatprep.subr.bf16.mxu1 %v1663_v0 }
 0x198   :  { %1540 = vmatpush3.bf16.msra.mxu1 %v1660_v10 }
 0x199   :  { %1541 = vmatprep.subr.bf16.mxu1 %v1663_v0 }
 0x19c   :  { %1542 = vmatpush3.bf16.msra.mxu1 %v1661_v12 }
 0x19f   :  { %1544 = vmatmul.mubr.bf16.vlgmr.msra.gmra.mrb[0].mxu1 %v2017_v52 }
 0x1a0   :  { %1547 = vmatprep.mubr.msk.bf16.mxu1 %vm1664_vm0, %v1663_v0 }
 0x1a7   :  { %1548 = vmatmul.mubr.bf16.gmra.mrb[4].mxu1 %v1000_v5 }
 0x1a8   :  { %1551 = vmatprep.mubr.msk.bf16.mxu1 %vm1664_vm0, %v1663_v0 }
 0x1af   :  { %1552 = vmatmul.mubr.bf16.gmra.mrb[8].mxu1 %v999_v14 }
 0x272   :  { %v1086_v17 = vpop.f32.mrb[0].mxu1 }
 0x273   :  { %v1120_v19 = vmul.f32 %v1305_v15, %v1086_v17  ;;  %v1545_v8 = vpop.f32.mrb[1].mxu1 }
 0x274   :  { %v1089_v21 = vpop.f32.mrb[2].mxu1 }
 0x275   :  { %v1132_v23 = vadd.f32 %v1306_v18, %v1120_v19  ;;  %v1121_v11 = vmul.f32 %v1305_v15, %v1089_v21  ;;  %v1546_v24 = vpop.f32.mrb[3].mxu1 }
 0x277   :  { %v1139_v25 = vadd.f32 %v1132_v23, %v1734_v7  ;;  %v1133_v43 = vadd.f32 %v1306_v18, %v1121_v11 }
 0x279   :  { %v1141_v0 = vmax.f32 %v1139_v25, 0.0  ;;  %v1140_v26 = vadd.f32 %v1133_v43, %v1741_v9 }
 0x27a   :  { %v1094_v27 = vpop.f32.mrb[4].mxu1 }
 0x27b   :  { %1143 = vst [vmem:[%s2144_s7] sm:$0xff] %v1141_v0  ;;  %v1142_v31 = vmax.f32 %v1140_v26, 0.0  ;;  %v1122_v32 = vmul.f32 %v1305_v15, %v1094_v27  ;;  %v1549_v59 = vpop.f32.mrb[5].mxu1 }
 0x27c   :  { %v1097_v33 = vpop.f32.mrb[6].mxu1 }
 0x27d   :  { %1144 = vst [vmem:[%s2144_s7 + $0x8] sm:$0xff] %v1142_v31  ;;  %v1134_v7 = vadd.f32 %v1306_v18, %v1122_v32  ;;  %v1123_v34 = vmul.f32 %v1305_v15, %v1097_v33  ;;  %v1550_v9 = vpop.f32.mrb[7].mxu1 }
 0x27f   :  { %v1156_v13 = vadd.f32 %v1150_v28, %v1134_v7  ;;  %v1135_v36 = vadd.f32 %v1306_v18, %v1123_v34 }
 0x281   :  { %v1159_v16 = vmax.f32 %v1156_v13, 0.0  ;;  %v1157_v37 = vadd.f32 %v1152_v35, %v1135_v36 }
 0x282   :  { %v1102_v38 = vpop.f32.mrb[8].mxu1 }
 0x283   :  { %1309 = vst [vmem:[%s2144_s7 + $0xe] sm:$0xfc] %v1159_v16  ;;  %v1160_v39 = vmax.f32 %v1157_v37, 0.0  ;;  %v1124_v40 = vmul.f32 %v1305_v15, %v1102_v38  ;;  %v1553_v41 = vpop.f32.mrb[9].mxu1 }
 0x284   :  { %v1105_v42 = vpop.f32.mrb[10].mxu1 }
 0x285   :  { %1310 = vst [vmem:[%s2144_s7 + $0x16] sm:$0xff] %v1160_v39  ;;  %v1136_v22 = vadd.f32 %v1306_v18, %v1124_v40  ;;  %v1554_v52 = vpop.f32.mrb[11].mxu1 }
 0x287   :  { %v1158_v44 = vadd.f32 %v1151_v30, %v1136_v22 }
 0x289   :  { %v1161_v45 = vmax.f32 %v1158_v44, 0.0 }
 0x28b   :  { %1311 = vst [vmem:[%s2144_s7 + $0x1e] sm:$0x3] %v1161_v45 }

</bundles_post_ra>
